<compile_context>
chip_gen: v5e
topology: v5e:2x2
jax: 0.10.0
libtpu: 0.0.40
codegen_flags: <defaults>
</compile_context>

<pallas_src>
import jax
import jax.numpy as jnp
from jax.experimental import pallas as pl
from jax.experimental.pallas import tpu as pltpu

# ---------------- config (mirrors cmd_args) ----------------
FEAT_DIM = 4      # cmd_args.feat_dim
LATENT_DIM = 32   # cmd_args.latent_dim
OUT_DIM = 32      # cmd_args.out_dim
MAX_LV = 3        # cmd_args.max_lv
NUM_GRAPHS = 2
NODES_PER_GRAPH = 8
N_NODES = NUM_GRAPHS * NODES_PER_GRAPH


def _s2v_mean_field_kernel(feat_ref, adj_ref,
                           wn_ref, bn_ref, wc_ref, bc_ref, wo_ref, bo_ref,
                           out_ref):
    """One grid step = one graph. Everything for this graph is VMEM-resident."""
    x = feat_ref[0]                      # (P, F_pad)  bf16
    adj = adj_ref[0]                     # (P, P)      bf16 (exact 0/1)
    wn = wn_ref[...]                     # (F_pad, D)  bf16
    wc = wc_ref[...]                     # (D, D)      bf16
    wo = wo_ref[...]                     # (D, O)      bf16
    bn = bn_ref[...]                     # (1, D)      f32
    bc = bc_ref[...]                     # (1, D)      f32
    bo = bo_ref[...]                     # (1, O)      f32

    # input_message = w_n2l(node_feat); f32 accumulation, f32 bias + relu.
    input_message = jnp.dot(x, wn, preferred_element_type=jnp.float32) + bn
    cur = jnp.maximum(input_message, 0.0)

    # hoist loop-invariant bias + message sum out of the message-passing loop
    msg_plus_bc = input_message + bc

    # mean-field message passing, statically unrolled (MAX_LV is a compile-time constant)
    for _ in range(MAX_LV):
        n2npool = jnp.dot(adj, cur.astype(jnp.bfloat16),
                          preferred_element_type=jnp.float32)
        node_linear = jnp.dot(n2npool.astype(jnp.bfloat16), wc,
                              preferred_element_type=jnp.float32)
        cur = jnp.maximum(node_linear + msg_plus_bc, 0.0)

    # out_params + relu
    out_linear = jnp.dot(cur.astype(jnp.bfloat16), wo,
                         preferred_element_type=jnp.float32) + bo
    reluact = jnp.maximum(out_linear, 0.0)             # (P, O) f32

    # per-graph sum pooling (replaces the dense subg_sp matmul); relu kept for fidelity.
    y = jnp.sum(reluact, axis=0, keepdims=True)        # (1, O)
    out_ref[0] = jnp.maximum(y, 0.0)


def graph_ebd_forward(node_feat, adj_blocks, params, *, nodes_per_graph=NODES_PER_GRAPH):
    """node_feat: [N, F] concatenated batch features; adj_blocks: [G, P, P] per-graph adjacency."""
    wn, bn, wc, bc, wo, bo = params
    G, P, _ = adj_blocks.shape
    F = node_feat.shape[-1]
    D = wc.shape[0]
    O = wo.shape[1]
    assert P == nodes_per_graph and node_feat.shape[0] == G * P

    # Pad the tiny K=FEAT_DIM matmul up to a sublane multiple (exact: zero columns/rows).
    F_pad = max(8, ((F + 7) // 8) * 8)
    feat3 = node_feat.reshape(G, P, F)
    feat3 = jnp.pad(feat3, ((0, 0), (0, 0), (0, F_pad - F)))
    wn_pad = jnp.pad(wn, ((0, F_pad - F), (0, 0)))

    # bf16 MXU operands (adjacency is 0/1 so the cast is exact); biases stay f32.
    feat_bf = feat3.astype(jnp.bfloat16)
    adj_bf = adj_blocks.astype(jnp.bfloat16)
    wn_bf = wn_pad.astype(jnp.bfloat16)
    wc_bf = wc.astype(jnp.bfloat16)
    wo_bf = wo.astype(jnp.bfloat16)

    def whole(a):
        # whole-array block, constant index_map -> stays VMEM-resident across grid steps
        return pl.BlockSpec(a.shape, lambda g: (0,) * a.ndim)

    out = pl.pallas_call(
        _s2v_mean_field_kernel,
        out_shape=jax.ShapeDtypeStruct((G, 1, O), jnp.float32),
        grid=(G,),
        in_specs=[
            pl.BlockSpec((1, P, F_pad), lambda g: (g, 0, 0)),   # this graph's features
            pl.BlockSpec((1, P, P), lambda g: (g, 0, 0)),       # this graph's adjacency block
            whole(wn_bf), whole(bn), whole(wc_bf), whole(bc), whole(wo_bf), whole(bo),
        ],
        out_specs=pl.BlockSpec((1, 1, O), lambda g: (g, 0, 0)),
        compiler_params=pltpu.CompilerParams(
            dimension_semantics=("parallel",)),                 # v7x: shard graphs across 2 TCs
    )(feat_bf, adj_bf, wn_bf, bn, wc_bf, bc, wo_bf, bo)
    return out.reshape(G, O)


# ---------------- references ----------------
def _reference_f32(node_feat, adj_full, pool, params):
    """Original PyTorch semantics, pure f32."""
    wn, bn, wc, bc, wo, bo = params
    im = node_feat @ wn + bn
    cur = jnp.maximum(im, 0.0)
    for _ in range(MAX_LV):
        cur = jnp.maximum((adj_full @ cur) @ wc + bc + im, 0.0)
    out = jnp.maximum(cur @ wo + bo, 0.0)
    return jnp.maximum(pool @ out, 0.0)


def _reference_bf16_matched(node_feat, adj_full, pool, params):
    """Same math with the kernel's numerics (bf16 MXU inputs, f32 accumulation)."""
    wn, bn, wc, bc, wo, bo = params
    bf = jnp.bfloat16
    dot = lambda a, b: jnp.dot(a.astype(bf), b.astype(bf),
                               preferred_element_type=jnp.float32)
    im = dot(node_feat, wn) + bn
    cur = jnp.maximum(im, 0.0)
    for _ in range(MAX_LV):
        cur = jnp.maximum(dot(dot(adj_full, cur), wc) + bc + im, 0.0)
    out = jnp.maximum(dot(cur, wo) + bo, 0.0)
    return jnp.maximum(pool @ out, 0.0)


def init_params(key):
    """Deterministic glorot-uniform-ish init (mirrors s2v_lib weights_init on the Linear layers)."""
    k1, k2, k3 = jax.random.split(key, 3)

    def glorot(k, shape):
        limit = jnp.sqrt(6.0 / (shape[0] + shape[1]))
        return jax.random.uniform(k, shape, jnp.float32, -limit, limit)

    wn = glorot(k1, (FEAT_DIM, LATENT_DIM))     # w_n2l (stored transposed: [in, out])
    bn = jnp.zeros((1, LATENT_DIM), jnp.float32)
    wc = glorot(k2, (LATENT_DIM, LATENT_DIM))   # conv_params
    bc = jnp.zeros((1, LATENT_DIM), jnp.float32)
    wo = glorot(k3, (LATENT_DIM, OUT_DIM))      # out_params
    bo = jnp.zeros((1, OUT_DIM), jnp.float32)
    return (wn, bn, wc, bc, wo, bo)


if __name__ == "__main__":
    key = jax.random.PRNGKey(0)
    kf, ka, kp = jax.random.split(key, 3)

    # PrepareFeatureLabel glue: concatenated node features of the batch of graphs.
    node_feat = jax.random.normal(kf, (N_NODES, FEAT_DIM), jnp.float32)

    # Per-graph dense n2n adjacency blocks (random symmetric 0/1, no self loops).
    blocks = []
    for g in range(NUM_GRAPHS):
        kg = jax.random.fold_in(ka, g)
        a = (jax.random.uniform(kg, (NODES_PER_GRAPH, NODES_PER_GRAPH)) < 0.4).astype(jnp.float32)
        a = jnp.triu(a, 1)
        blocks.append(a + a.T)
    adj_blocks = jnp.stack(blocks)                                   # [G, P, P] (kernel input)
    adj_full = jax.scipy.linalg.block_diag(*blocks)                  # [N, N]   (reference only)

    # subg_sp: graph-membership pooling matrix [G, N] (sum-pool) — reference only.
    pool = jnp.zeros((NUM_GRAPHS, N_NODES), jnp.float32)
    for g in range(NUM_GRAPHS):
        pool = pool.at[g, g * NODES_PER_GRAPH:(g + 1) * NODES_PER_GRAPH].set(1.0)

    params = init_params(jax.random.PRNGKey(42))

    embed = graph_ebd_forward(node_feat, adj_blocks, params)
    embed = jax.block_until_ready(embed)
    assert embed.shape == (NUM_GRAPHS, OUT_DIM)

    # Tight check against a reference with matching numerics (bf16 MXU inputs, f32 accumulation).
    ref_matched = _reference_bf16_matched(node_feat, adj_full, pool, params)
    assert jnp.allclose(embed, ref_matched, atol=1e-3, rtol=1e-3), "mismatch vs. bf16-matched reference"

    # Loose check against the exact f32 PyTorch-semantics reference (bf16 rounding budget).
    ref_f32 = _reference_f32(node_feat, adj_full, pool, params)
    assert jnp.allclose(embed, ref_f32, atol=5e-2, rtol=5e-2), "mismatch vs. f32 reference"

    print("KERNEL_OK")
</pallas_src>

<mosaic_0001>
module attributes {stable_mosaic.version = 11 : i64} {
  func.func @_s2v_mean_field_kernel(%arg0: i32, %arg1: memref<1x8x8xbf16, #tpu.memory_space<vmem>>, %arg2: memref<1x8x8xbf16, #tpu.memory_space<vmem>>, %arg3: memref<8x32xbf16, #tpu.memory_space<vmem>>, %arg4: memref<1x32xf32, #tpu.memory_space<vmem>>, %arg5: memref<32x32xbf16, #tpu.memory_space<vmem>>, %arg6: memref<1x32xf32, #tpu.memory_space<vmem>>, %arg7: memref<32x32xbf16, #tpu.memory_space<vmem>>, %arg8: memref<1x32xf32, #tpu.memory_space<vmem>>, %arg9: memref<1x1x32xf32, #tpu.memory_space<vmem>>) attributes {dimension_semantics = [#tpu.dimension_semantics<parallel>], iteration_bounds = array<i64: 2>, scalar_prefetch = 0 : i64, scratch_operands = 0 : i64, tpu.core_type = #tpu.core_type<tc>, window_params = [{transform_indices = @transform_0, window_bounds = array<i64: 1, 8, 8>}, {transform_indices = @transform_1, window_bounds = array<i64: 1, 8, 8>}, {pipeline_mode = #tpu.pipeline_mode<synchronous>, transform_indices = @transform_2, window_bounds = array<i64: 8, 32>}, {pipeline_mode = #tpu.pipeline_mode<synchronous>, transform_indices = @transform_3, window_bounds = array<i64: 1, 32>}, {pipeline_mode = #tpu.pipeline_mode<synchronous>, transform_indices = @transform_4, window_bounds = array<i64: 32, 32>}, {pipeline_mode = #tpu.pipeline_mode<synchronous>, transform_indices = @transform_5, window_bounds = array<i64: 1, 32>}, {pipeline_mode = #tpu.pipeline_mode<synchronous>, transform_indices = @transform_6, window_bounds = array<i64: 32, 32>}, {pipeline_mode = #tpu.pipeline_mode<synchronous>, transform_indices = @transform_7, window_bounds = array<i64: 1, 32>}, {transform_indices = @transform_8, window_bounds = array<i64: 1, 1, 32>}]} {
    %c0 = arith.constant 0 : index
    %c0_0 = arith.constant 0 : index
    %c0_1 = arith.constant 0 : index
    %0 = vector.load %arg1[%c0, %c0_0, %c0_1] : memref<1x8x8xbf16, #tpu.memory_space<vmem>>, vector<1x8x8xbf16>
    %1 = vector.shape_cast %0 : vector<1x8x8xbf16> to vector<8x8xbf16>
    %c0_2 = arith.constant 0 : index
    %c0_3 = arith.constant 0 : index
    %c0_4 = arith.constant 0 : index
    %2 = vector.load %arg2[%c0_2, %c0_3, %c0_4] : memref<1x8x8xbf16, #tpu.memory_space<vmem>>, vector<1x8x8xbf16>
    %3 = vector.shape_cast %2 : vector<1x8x8xbf16> to vector<8x8xbf16>
    %c0_5 = arith.constant 0 : index
    %c0_6 = arith.constant 0 : index
    %4 = vector.load %arg3[%c0_5, %c0_6] : memref<8x32xbf16, #tpu.memory_space<vmem>>, vector<8x32xbf16>
    %c0_7 = arith.constant 0 : index
    %c0_8 = arith.constant 0 : index
    %5 = vector.load %arg5[%c0_7, %c0_8] : memref<32x32xbf16, #tpu.memory_space<vmem>>, vector<32x32xbf16>
    %c0_9 = arith.constant 0 : index
    %c0_10 = arith.constant 0 : index
    %6 = vector.load %arg7[%c0_9, %c0_10] : memref<32x32xbf16, #tpu.memory_space<vmem>>, vector<32x32xbf16>
    %c0_11 = arith.constant 0 : index
    %c0_12 = arith.constant 0 : index
    %7 = vector.load %arg4[%c0_11, %c0_12] : memref<1x32xf32, #tpu.memory_space<vmem>>, vector<1x32xf32>
    %c0_13 = arith.constant 0 : index
    %c0_14 = arith.constant 0 : index
    %8 = vector.load %arg6[%c0_13, %c0_14] : memref<1x32xf32, #tpu.memory_space<vmem>>, vector<1x32xf32>
    %c0_15 = arith.constant 0 : index
    %c0_16 = arith.constant 0 : index
    %9 = vector.load %arg8[%c0_15, %c0_16] : memref<1x32xf32, #tpu.memory_space<vmem>>, vector<1x32xf32>
    %cst = arith.constant dense<0.000000e+00> : vector<8x32xf32>
    %10 = tpu.matmul %1, %4, %cst {dimension_numbers = #tpu.dot_dimension_numbers<[1], [0], [0], [1], [0, 0, 1, 1], [], []>} : vector<8x8xbf16>, vector<8x32xbf16>, vector<8x32xf32> -> vector<8x32xf32>
    %11 = vector.broadcast %7 : vector<1x32xf32> to vector<8x32xf32>
    %12 = arith.addf %10, %11 : vector<8x32xf32>
    %cst_17 = arith.constant 0.000000e+00 : f32
    %13 = vector.broadcast %cst_17 : f32 to vector<8x32xf32>
    %14 = arith.maximumf %12, %13 : vector<8x32xf32>
    %15 = vector.broadcast %8 : vector<1x32xf32> to vector<8x32xf32>
    %16 = arith.addf %12, %15 : vector<8x32xf32>
    %17 = arith.truncf %14 : vector<8x32xf32> to vector<8x32xbf16>
    %cst_18 = arith.constant dense<0.000000e+00> : vector<8x32xf32>
    %18 = tpu.matmul %3, %17, %cst_18 {dimension_numbers = #tpu.dot_dimension_numbers<[1], [0], [0], [1], [0, 0, 1, 1], [], []>} : vector<8x8xbf16>, vector<8x32xbf16>, vector<8x32xf32> -> vector<8x32xf32>
    %19 = arith.truncf %18 : vector<8x32xf32> to vector<8x32xbf16>
    %cst_19 = arith.constant dense<0.000000e+00> : vector<8x32xf32>
    %20 = tpu.matmul %19, %5, %cst_19 {dimension_numbers = #tpu.dot_dimension_numbers<[1], [0], [0], [1], [0, 0, 1, 1], [], []>} : vector<8x32xbf16>, vector<32x32xbf16>, vector<8x32xf32> -> vector<8x32xf32>
    %21 = arith.addf %20, %16 : vector<8x32xf32>
    %cst_20 = arith.constant 0.000000e+00 : f32
    %22 = vector.broadcast %cst_20 : f32 to vector<8x32xf32>
    %23 = arith.maximumf %21, %22 : vector<8x32xf32>
    %24 = arith.truncf %23 : vector<8x32xf32> to vector<8x32xbf16>
    %cst_21 = arith.constant dense<0.000000e+00> : vector<8x32xf32>
    %25 = tpu.matmul %3, %24, %cst_21 {dimension_numbers = #tpu.dot_dimension_numbers<[1], [0], [0], [1], [0, 0, 1, 1], [], []>} : vector<8x8xbf16>, vector<8x32xbf16>, vector<8x32xf32> -> vector<8x32xf32>
    %26 = arith.truncf %25 : vector<8x32xf32> to vector<8x32xbf16>
    %cst_22 = arith.constant dense<0.000000e+00> : vector<8x32xf32>
    %27 = tpu.matmul %26, %5, %cst_22 {dimension_numbers = #tpu.dot_dimension_numbers<[1], [0], [0], [1], [0, 0, 1, 1], [], []>} : vector<8x32xbf16>, vector<32x32xbf16>, vector<8x32xf32> -> vector<8x32xf32>
    %28 = arith.addf %27, %16 : vector<8x32xf32>
    %cst_23 = arith.constant 0.000000e+00 : f32
    %29 = vector.broadcast %cst_23 : f32 to vector<8x32xf32>
    %30 = arith.maximumf %28, %29 : vector<8x32xf32>
    %31 = arith.truncf %30 : vector<8x32xf32> to vector<8x32xbf16>
    %cst_24 = arith.constant dense<0.000000e+00> : vector<8x32xf32>
    %32 = tpu.matmul %3, %31, %cst_24 {dimension_numbers = #tpu.dot_dimension_numbers<[1], [0], [0], [1], [0, 0, 1, 1], [], []>} : vector<8x8xbf16>, vector<8x32xbf16>, vector<8x32xf32> -> vector<8x32xf32>
    %33 = arith.truncf %32 : vector<8x32xf32> to vector<8x32xbf16>
    %cst_25 = arith.constant dense<0.000000e+00> : vector<8x32xf32>
    %34 = tpu.matmul %33, %5, %cst_25 {dimension_numbers = #tpu.dot_dimension_numbers<[1], [0], [0], [1], [0, 0, 1, 1], [], []>} : vector<8x32xbf16>, vector<32x32xbf16>, vector<8x32xf32> -> vector<8x32xf32>
    %35 = arith.addf %34, %16 : vector<8x32xf32>
    %cst_26 = arith.constant 0.000000e+00 : f32
    %36 = vector.broadcast %cst_26 : f32 to vector<8x32xf32>
    %37 = arith.maximumf %35, %36 : vector<8x32xf32>
    %38 = arith.truncf %37 : vector<8x32xf32> to vector<8x32xbf16>
    %cst_27 = arith.constant dense<0.000000e+00> : vector<8x32xf32>
    %39 = tpu.matmul %38, %6, %cst_27 {dimension_numbers = #tpu.dot_dimension_numbers<[1], [0], [0], [1], [0, 0, 1, 1], [], []>} : vector<8x32xbf16>, vector<32x32xbf16>, vector<8x32xf32> -> vector<8x32xf32>
    %40 = vector.broadcast %9 : vector<1x32xf32> to vector<8x32xf32>
    %41 = arith.addf %39, %40 : vector<8x32xf32>
    %cst_28 = arith.constant 0.000000e+00 : f32
    %42 = vector.broadcast %cst_28 : f32 to vector<8x32xf32>
    %43 = arith.maximumf %41, %42 : vector<8x32xf32>
    %cst_29 = arith.constant dense<0.000000e+00> : vector<32xf32>
    %44 = vector.multi_reduction <add>, %43, %cst_29 [0] : vector<8x32xf32> to vector<32xf32>
    %45 = vector.shape_cast %44 : vector<32xf32> to vector<1x32xf32>
    %cst_30 = arith.constant 0.000000e+00 : f32
    %46 = vector.broadcast %cst_30 : f32 to vector<1x32xf32>
    %47 = arith.maximumf %45, %46 : vector<1x32xf32>
    %c0_31 = arith.constant 0 : index
    %c0_32 = arith.constant 0 : index
    %c0_33 = arith.constant 0 : index
    %48 = vector.load %arg9[%c0_31, %c0_32, %c0_33] : memref<1x1x32xf32, #tpu.memory_space<vmem>>, vector<1x1x32xf32>
    %49 = vector.shape_cast %48 : vector<1x1x32xf32> to vector<1x32xf32>
    %50 = vector.shape_cast %47 : vector<1x32xf32> to vector<1x1x32xf32>
    tpu.vector_store %arg9[%c0_31, %c0_32, %c0_33], %50 {strides = array<i32>} : memref<1x1x32xf32, #tpu.memory_space<vmem>>, vector<1x1x32xf32>,
    return
  }
  func.func @transform_0(%arg0: i32) -> (i32, i32, i32) {
    %c0_i32 = arith.constant 0 : i32
    %c0_i32_0 = arith.constant 0 : i32
    %c0_i32_1 = arith.constant 0 : i32
    return %arg0, %c0_i32, %c0_i32_0 : i32, i32, i32
  }
  func.func @transform_1(%arg0: i32) -> (i32, i32, i32) {
    %c0_i32 = arith.constant 0 : i32
    %c0_i32_0 = arith.constant 0 : i32
    %c0_i32_1 = arith.constant 0 : i32
    return %arg0, %c0_i32, %c0_i32_0 : i32, i32, i32
  }
  func.func @transform_2(%arg0: i32) -> (i32, i32) {
    %c0_i32 = arith.constant 0 : i32
    %c0_i32_0 = arith.constant 0 : i32
    %c0_i32_1 = arith.constant 0 : i32
    return %c0_i32, %c0_i32_0 : i32, i32
  }
  func.func @transform_3(%arg0: i32) -> (i32, i32) {
    %c0_i32 = arith.constant 0 : i32
    %c0_i32_0 = arith.constant 0 : i32
    %c0_i32_1 = arith.constant 0 : i32
    return %c0_i32, %c0_i32_0 : i32, i32
  }
  func.func @transform_4(%arg0: i32) -> (i32, i32) {
    %c0_i32 = arith.constant 0 : i32
    %c0_i32_0 = arith.constant 0 : i32
    %c0_i32_1 = arith.constant 0 : i32
    return %c0_i32, %c0_i32_0 : i32, i32
  }
  func.func @transform_5(%arg0: i32) -> (i32, i32) {
    %c0_i32 = arith.constant 0 : i32
    %c0_i32_0 = arith.constant 0 : i32
    %c0_i32_1 = arith.constant 0 : i32
    return %c0_i32, %c0_i32_0 : i32, i32
  }
  func.func @transform_6(%arg0: i32) -> (i32, i32) {
    %c0_i32 = arith.constant 0 : i32
    %c0_i32_0 = arith.constant 0 : i32
    %c0_i32_1 = arith.constant 0 : i32
    return %c0_i32, %c0_i32_0 : i32, i32
  }
  func.func @transform_7(%arg0: i32) -> (i32, i32) {
    %c0_i32 = arith.constant 0 : i32
    %c0_i32_0 = arith.constant 0 : i32
    %c0_i32_1 = arith.constant 0 : i32
    return %c0_i32, %c0_i32_0 : i32, i32
  }
  func.func @transform_8(%arg0: i32) -> (i32, i32, i32) {
    %c0_i32 = arith.constant 0 : i32
    %c0_i32_0 = arith.constant 0 : i32
    %c0_i32_1 = arith.constant 0 : i32
    return %arg0, %c0_i32, %c0_i32_0 : i32, i32, i32
  }
}

</mosaic_0001>

<bundles_post_ra>
// kernel: tpu_custom_call.1
= control target key start
LH: loop header
LB: loop body
LE: loop exit
PB: predicated region body
PF: predicated region fallthrough
CT: control target
= control target key end

     0   :  { %s1365_s0 = inlined_call_operand.hbm [shape: bf16[2,8,8], index: 0, kind: input, shape index: {}]   ;;  %s1366_s1 = inlined_call_operand.hbm [shape: bf16[2,8,8], index: 1, kind: input, shape index: {}]   ;;  %s1367_s2 = inlined_call_operand.hbm [shape: bf16[8,32], index: 2, kind: input, shape index: {}]   ;;  %s1368_s3 = inlined_call_operand.vmem [shape: f32[1,32], index: 3, kind: input, shape index: {}]   ;;  %s1369_s4 = inlined_call_operand.hbm [shape: bf16[32,32], index: 4, kind: input, shape index: {}]   ;;  %s1370_s5 = inlined_call_operand.vmem [shape: f32[1,32], index: 5, kind: input, shape index: {}]   ;;  %s1371_s6 = inlined_call_operand.hbm [shape: bf16[32,32], index: 6, kind: input, shape index: {}]   ;;  %s1372_s7 = inlined_call_operand.vmem [shape: f32[1,32], index: 7, kind: input, shape index: {}]   ;;  %s1373_s8 = inlined_call_operand.hbm [shape: f32[2,1,32], index: 8, kind: output, shape index: {}]  }
   0x1   :  { %1378 = sst [smem:[#allocation21_spill]] %s1367_s2 }
   0x2   :  { %1379 = sst [smem:[#allocation22_spill]] %s1369_s4 }
   0x3   :  { %1380 = sst [smem:[#allocation23_spill]] %s1371_s6 }
   0x4   :  { %13 = vsyncpa [#allocation3], 0 }
   0x5   :  { %15 = vsyncpa [#allocation3 + $0x1], 0 }
   0x6   :  { %16 = vsyncpa [#allocation6], 0 }
   0x7   :  { %18 = vsyncpa [#allocation6 + $0x1], 0 }
   0x8   :  { %19 = vsyncpa [#allocation9], 0 }
   0x9   :  { %20 = vsyncpa [#allocation4], 0 }
   0xa   :  { %22 = vsyncpa [#allocation4 + $0x1], 0  ;;  %s1159_s27 = smov 0   ;;  %s1161_s28 = smov 0  }
   0xb   :  { %s1163_s29 = smov 0   ;;  %s1165_s30 = smov 0  }
   0xc LB: > { %1381 = sst [smem:[#allocation17_spill]] %s1103_s29  ;;  %s1180_s9 = sadd.s32 4294967295, %s1107_s30   ;;  %s1107_s30 = sphi %s1165_s30, %s1396_s30   ;;  %s1103_s29 = sphi %s1163_s29, %s1398_s29   ;;  %s1099_s28 = sphi %s1161_s28, %s1400_s28   ;;  %s1095_s27 = sphi %s1159_s27, %s1399_s27  }
   0xd   : > { %1382 = sst [smem:[#allocation18_spill]] %s1107_s30  ;;  %s746_s10 = sadd.s32 4294967294, %s1107_s30  }
   0xe   : > { %p48_p0 = scmp.ne.s32.totalorder %s1099_s28, %s1095_s27  ;;  %p49_p1 = scmp.eq.s32.totalorder %s1180_s9, 0 }
   0xf   : > { %p224_p2 = scmp.eq.s32.totalorder %s1180_s9, 1  ;;  %p230_p3 = scmp.eq.s32.totalorder %s746_s10, 1 }
  0x10   : > { %p1189_p4 = por %p49_p1, %p48_p0  ;;  %p747_p5 = scmp.ge.s32.totalorder %s1107_s30, 1 }
  0x11   : > { %p1194_p6 = por %p230_p3, %p48_p0  ;;  %p237_p7 = scmp.lt.s32.totalorder %s1107_s30, 3 }
  0x12   : > { %s1385_s2 = sld [smem:[#allocation21_spill]]  ;;  %s1109_s17 = smov [#allocation7]  }
  0x13   : > { %p1202_p8 = pnand %p747_p5, %p237_p7  ;;  %s251_s18 = sshll.u32 %s1109_s17, 4  ;;  %s252_s18 = int_to_ptr.vmem [resolvable:$true] %s251_s18 }
  0x14   : > { %s1387_s4 = sld [smem:[#allocation22_spill]]  ;;  %s1110_s23 = smov [#allocation8]  }
  0x15   : > { %p810_p10 = pneg %p1202_p8  ;;  %s265_s24 = sshll.u32 %s1110_s23, 4  ;;  %s266_s24 = int_to_ptr.vmem [resolvable:$true] %s265_s24 }
  0x16   : > { %s1111_s25 = smov 64   ;;  %s1112_s26 = smov 4  }
  0x17   : > { %p1214_p11 = pnand %p810_p10, %p49_p1  ;;  %s1389_s6 = sld [smem:[#allocation23_spill]] }
  0x18   : > { %s249_s15 = sshll.u32 %s1385_s2, 4  ;;  %s1113_s17 = smov [#allocation10]   ;;  %s250_s15 = int_to_ptr.hbm [resolvable:$true] %s249_s15 }
  0x19   : > { %813 = dma.hbm_to_vmem [thread:$0]  (!%p1214_p11), %s250_s15, 64, %s252_s18, [#allocation6]  }
  0x1a   : > { %s263_s21 = sshll.u32 %s1387_s4, 4  ;;  %s282_s19 = sshll.u32 %s1113_s17, 4  ;;  %s264_s21 = int_to_ptr.hbm [resolvable:$true] %s263_s21  ;;  %s283_s19 = int_to_ptr.vmem [resolvable:$true] %s282_s19 }
  0x1b   : > { %816 = dma.hbm_to_vmem [thread:$0]  (!%p1214_p11), %s264_s21, 256, %s266_s24, [#allocation9], %s1111_s25, %s1111_s25, %s1112_s26  }
  0x1c   : > { %s1228_s15 = sadd.s32 1, %s1107_s30   ;;  %s35_s20 = sadd.s32 1, %s1103_s29 }
  0x1d   : > { %s280_s14 = sshll.u32 %s1389_s6, 4  ;;  %1390 = sst [smem:[#allocation19_spill]] %s1228_s15  ;;  %s281_s14 = int_to_ptr.hbm [resolvable:$true] %s280_s14 }
  0x1e   : > { %819 = dma.hbm_to_vmem [thread:$0]  (!%p1214_p11), %s281_s14, 256, %s283_s19, [#allocation9], %s1111_s25, %s1111_s25, %s1112_s26  }
  0x1f   : > { %s32_s18 = ssub.s32 %s1107_s30, %s1228_s15  ;;  %p42_p13 = scmp.ne.s32.totalorder %s1103_s29, %s1099_s28 }
  0x20   : > { %p33_p12 = scmp.eq.s32.totalorder %s32_s18, 0  ;;  %p43_p0 = scmp.eq.s32.totalorder %s1107_s30, 0 }
  0x21   : > { %p834_p3 = scmp.lt.s32.totalorder %s1107_s30, 2  ;;  %p1242_p7 = por %p224_p2, %p42_p13 }
  0x22   : > { %s1238_s21 = scalar_select %p33_p12, %s1103_s29, %s35_s20  }
  0x23   : > { %p44_p5 = por %p43_p0, %p42_p13  ;;  %s299_s22 = sand.u32 1, %s1103_s29  }
  0x24   : > { %1391 = sst [smem:[#allocation20_spill]] %s1238_s21  ;;  %s753_s24 = sshll.u32 %s1107_s30, 2 }
  0x25   : > { %s752_s25 = sshll.u32 %s299_s22, 2  ;;  %s307_s13 = scalar_lea.hbm %s1365_s0, %s753_s24 }
  0x26   : > { %s309_s14 = sshll.u32 %s307_s13, 4  ;;  %s303_s17 = scalar_lea.vmem [#allocation2], %s752_s25  ;;  %s310_s14 = int_to_ptr.hbm [resolvable:$true] %s309_s14 }
  0x27   : > { %s311_s19 = sshll.u32 %s303_s17, 4  ;;  %p1253_p10 = pnand %p834_p3, %p44_p5  ;;  %s312_s19 = int_to_ptr.vmem [resolvable:$true] %s311_s19 }
  0x28   : > { %s326_s4 = scalar_lea.hbm %s1366_s1, %s753_s24  ;;  %s318_s6 = sand.u32 1, %s1107_s30  }
  0x29   : > { %s300_s21 = scalar_lea.sflag [#allocation3], %s299_s22  ;;  %s969_s26 = sshra.s32 %s310_s14, 4  ;;  %s970_s26 = int_to_ptr.hbm [resolvable:$true] %s969_s26 }
  0x2a   : > { %s971_s10 = scalar_lea.hbm %s970_s26, 4  ;;  %p973_p11 = pneg %p1253_p10 }
  0x2b   : > { %p972_p2 = scmp.ne.s32.totalorder %s970_s26, %s971_s10  ;;  %s976_s29 = scalar_lea.hbm %s1365_s0, 8 }
  0x2c   : > { %p977_p0 = scmp.lt.s32.totalorder %s970_s26, %s1365_s0  ;;  %p978_p3 = scmp.lt.s32.totalorder %s976_s29, %s971_s10 }
  0x2d   : > { %p974_p12 = pnand %p973_p11, %p972_p2 }
  0x2e   : > { %p979_p5 = por %p978_p3, %p977_p0 }
  0x2f   : > { %p975_p13 = pneg %p974_p12 }
  0x31   : > { %p980_p9 = pnand %p979_p5, %p975_p13 }
  0x33   : > { %983 = shalt.err (!%p980_p9)
}
  0x34   : > { %823 = dma.hbm_to_vmem [thread:$0]  (!%p1253_p10), %s310_s14, 64, %s312_s19, %s300_s21  }
  0x35   : > { %s328_s22 = sshll.u32 %s326_s4, 4  ;;  %s322_s24 = scalar_lea.vmem [#allocation5], %s752_s25  ;;  %s329_s22 = int_to_ptr.hbm [resolvable:$true] %s328_s22 }
  0x36   : > { %s330_s15 = sshll.u32 %s322_s24, 4  ;;  %s319_s30 = scalar_lea.sflag [#allocation6], %s318_s6  ;;  %s331_s15 = int_to_ptr.vmem [resolvable:$true] %s330_s15 }
  0x37   : > { %s999_s13 = sshra.s32 %s329_s22, 4  ;;  %s1006_s10 = scalar_lea.hbm %s1366_s1, 8  ;;  %s1000_s13 = int_to_ptr.hbm [resolvable:$true] %s999_s13 }
  0x38   : > { %s1001_s17 = scalar_lea.hbm %s1000_s13, 4  ;;  %p1007_p9 = scmp.lt.s32.totalorder %s1000_s13, %s1366_s1 }
  0x39   : > { %p1002_p2 = scmp.ne.s32.totalorder %s1000_s13, %s1001_s17  ;;  %p1008_p13 = scmp.lt.s32.totalorder %s1006_s10, %s1001_s17 }
  0x3b   : > { %p1004_p12 = pnand %p1002_p2, %p973_p11  ;;  %p1009_p3 = por %p1008_p13, %p1007_p9 }
  0x3d   : > { %p1005_p0 = pneg %p1004_p12 }
  0x3f   : > { %p1010_p5 = pnand %p1009_p3, %p1005_p0 }
  0x41   : > { %1013 = shalt.err (!%p1010_p5)
}
  0x42   : > { %826 = dma.hbm_to_vmem [thread:$0]  (!%p1253_p10), %s329_s22, 64, %s331_s15, %s319_s30  }
  0x43   : > { %339 = sbr.rel (%p1202_p8) target bundleno = 1181 (0x49d), region = 52  ;;  %s1288_s4 = sand.u32 (!%p1202_p8), 1, %s1099_s28  }
  0x44   : > { %s757_s6 = sshll.u32 (!%p1202_p8), %s1288_s4, 2  ;;  %s342_s25 = scalar_lea.sflag (!%p1202_p8), [#allocation3], %s1288_s4 }
  0x45   : > { %s345_s14 = scalar_lea.vmem (!%p1202_p8), [#allocation2], %s757_s6 }
  0x48   : > { %1074 = dma.done.wait (%p1189_p4), %s342_s25, 64  }
  0x49   : > { %1076 = vsyncadd (%p1189_p4), %s342_s25, 4294967232  ;;  %s351_s30 = sand.u32 1, %s1180_s9   ;;  %s355_s16 = scalar_lea.vmem [#allocation5], %s757_s6 }
  0x4a   : > { %s352_s15 = scalar_lea.sflag [#allocation6], %s351_s30 }
  0x4b   : > { %1078 = dma.done.wait (%p1189_p4), %s352_s15, 64  }
  0x4c   : > { %1080 = vsyncadd (%p1189_p4), %s352_s15, 4294967232 }
  0x4d   : > { %1082 = dma.done.wait (%p49_p1), [#allocation6], 64  }
  0x4e   : > { %1084 = vsyncadd (%p49_p1), [#allocation6], 4294967232 }
  0x4f   : > { %1086 = dma.done.wait (%p49_p1), [#allocation9], 512  }
  0x50   : > { %1088 = vsyncadd (%p49_p1), [#allocation9], 4294966784  ;;  %vm430_vm0 = vcmask 1043456   ;;  %v411_v0 = vld [vmem:[#allocation7] sm:$0xf]  ;;  %vm426_vm1 = vcmask 64512   ;;  %s625_s29 = scalar_lea.hbm %s1373_s8, %s1180_s9 }
  0x51   : > { %v432_v1 = vsel %vm430_vm0, %v411_v0, 0  ;;  %v409_v2 = vld [vmem:[%s345_s14] sm:$0xf]  ;;  %v410_v11 = vld [vmem:[%s355_s16] sm:$0xf]  ;;  %v788_v12 = vld [vmem:[#allocation8] sm:$0xff] }
  0x52   : > { %441 = vmatpush.bf16.msra.mxu0 %v432_v1  ;;  %v789_v3 = vld [vmem:[#allocation8 + $0x8] sm:$0xff]  ;;  %vm485_vm2 = vcmask 261120   ;;  %v791_v36 = vld [vmem:[#allocation10 + $0x8] sm:$0xff]  ;;  %v790_v37 = vld [vmem:[#allocation10] sm:$0xff]  ;;  %s407_s26 = scalar_lea.vmem [#allocation11], %s1288_s4  ;;  %s629_s2 = sshll.u32 %s625_s29, 4  ;;  %s630_s2 = int_to_ptr.hbm [resolvable:$true] %s629_s2 }
  0x53   : > { %495 = vmatpush.bf16.msra.mxu2 %v789_v3  ;;  %v876_v4 = vld [vmem:[%s1368_s3] ss:$0 sm:$0xff]  ;;  %s627_s10 = sshll.u32 %s407_s26, 4  ;;  %vm614_vm3 = vcmask 253952   ;;  %s617_s21 = scalar_lea.sflag [#allocation4], %s1288_s4  ;;  %s628_s10 = int_to_ptr.vmem [resolvable:$true] %s627_s10 }
  0x54   : > { %v877_v16 = vld [vmem:[%s1370_s5] ss:$0 sm:$0xff]  ;;  %s1043_s6 = sshra.s32 %s630_s2, 4  ;;  %s1049_s30 = scalar_lea.hbm %s1373_s8, 2  ;;  %s1044_s6 = int_to_ptr.hbm [resolvable:$true] %s1043_s6 }
  0x55   : > { %762 = vmatmul.msk.bf16.vlgmr.msra.gmra.mxu0 %vm426_vm1, %v409_v2  ;;  %v878_v43 = vld [vmem:[%s1372_s7] ss:$0 sm:$0xff]  ;;  %s1045_s25 = scalar_lea.hbm %s1044_s6, 1  ;;  %p1050_p10 = scmp.lt.s32.totalorder %s1044_s6, %s1373_s8 }
  0x56   : > { %530 = vmatpush.bf16.msrb.mxu0 %v789_v3  ;;  %p1046_p1 = scmp.ne.s32.totalorder %s1044_s6, %s1045_s25  ;;  %p1051_p11 = scmp.lt.s32.totalorder %s1049_s30, %s1045_s25 }
  0x57   : > { %496 = vmatpush.bf16.msra.mxu2 %v788_v12 }
  0x58   : > { %p1047_p4 = pnand %p1046_p1, %p1242_p7  ;;  %p1052_p2 = por %p1051_p11, %p1050_p10 }
  0x5a   : > { %531 = vmatpush.bf16.msrb.mxu0 %v788_v12  ;;  %p1048_p8 = pneg %p1047_p4 }
  0x5b   : > { %598 = vmatpush.bf16.msrb.mxu2 %v791_v36 }
  0x5c   : > { %p1053_p12 = pnand %p1052_p2, %p1048_p8 }
  0x5f   : > { %599 = vmatpush.bf16.msrb.mxu2 %v790_v37 }
  0xd2   : > { %v443_v5 = vpop.f32.mrf.mxu0 }
  0xd3   : > { %v444_v6 = vadd.f32 %v876_v4, %v443_v5 }
  0xd5   : > { %v447_v7 = vmax.f32 %v444_v6, 0.0  ;;  %v451_v17 = vadd.f32 %v877_v16, %v444_v6 }
  0xd7   : > { %v452_v8 = vpack.c.bf16 %v447_v7, %v447_v7 }
  0xd9   : > { %v457_v9 = vsel %vm430_vm0, %v452_v8, 0 }
  0xda   : > { %v445_v10 = vpop.f32.mrf.mxu0  ;;  %466 = vmatpush.bf16.msra.mxu1 %v457_v9 }
  0xdd   : > { %763 = vmatmul.msk.bf16.vlgmr.msra.gmra.mxu1 %vm426_vm1, %v410_v11 }
 0x15a   : > { %v468_v13 = vpop.f32.mrf.mxu1 }
 0x15b   : > { %v472_v14 = vpack.c.bf16 %v468_v13, %v468_v13 }
 0x15d   : > { %772 = vmatmul.msk.bf16.vlgmr.msra.gmra.mxu2 %vm485_vm2, %v472_v14 }
 0x162   : > { %v470_v15 = vpop.f32.mrf.mxu1 }
 0x1e0   : > { %v498_v18 = vpop.f32.mrf.mxu2 }
 0x1e1   : > { %v499_v19 = vadd.f32 %v498_v18, %v451_v17 }
 0x1e3   : > { %v502_v20 = vmax.f32 %v499_v19, 0.0 }
 0x1e5   : > { %v503_v21 = vpack.c.bf16 %v502_v20, %v502_v20 }
 0x1e7   : > { %v505_v22 = vsel %vm430_vm0, %v503_v21, 0 }
 0x1e8   : > { %v500_v23 = vpop.f32.mrf.mxu2  ;;  %514 = vmatpush.bf16.msra.mxu3 %v505_v22 }
 0x1eb   : > { %773 = vmatmul.msk.bf16.vlgmr.msra.gmra.mxu3 %vm426_vm1, %v410_v11 }
 0x1ec   : > { %565 = vmatpush.bf16.msrb.mxu3 %v789_v3 }
 0x1f0   : > { %566 = vmatpush.bf16.msrb.mxu3 %v788_v12 }
 0x26e   : > { %v516_v24 = vpop.f32.mrf.mxu3 }
 0x26f   : > { %v520_v25 = vpack.c.bf16 %v516_v24, %v516_v24 }
 0x271   : > { %774 = vmatmul.msk.bf16.vlgmr.msrb.gmra.mxu0 %vm485_vm2, %v520_v25 }
 0x276   : > { %v518_v26 = vpop.f32.mrf.mxu3 }
 0x2ee   : > { %v533_v27 = vpop.f32.mrf.mxu0 }
 0x2ef   : > { %v534_v28 = vadd.f32 %v533_v27, %v451_v17 }
 0x2f1   : > { %v537_v29 = vmax.f32 %v534_v28, 0.0 }
 0x2f3   : > { %v538_v30 = vpack.c.bf16 %v537_v29, %v537_v29 }
 0x2f5   : > { %v540_v31 = vsel %vm430_vm0, %v538_v30, 0 }
 0x2f6   : > { %v535_v32 = vpop.f32.mrf.mxu0  ;;  %549 = vmatpush.bf16.msrb.mxu1 %v540_v31 }
 0x2f9   : > { %775 = vmatmul.msk.bf16.vlgmr.msrb.gmra.mxu1 %vm426_vm1, %v410_v11 }
 0x376   : > { %v551_v33 = vpop.f32.mrf.mxu1 }
 0x377   : > { %v555_v34 = vpack.c.bf16 %v551_v33, %v551_v33 }
 0x379   : > { %776 = vmatmul.msk.bf16.vlgmr.msrb.gmra.mxu3 %vm485_vm2, %v555_v34 }
 0x37e   : > { %v553_v35 = vpop.f32.mrf.mxu1 }
 0x3fc   : > { %v568_v38 = vpop.f32.mrf.mxu3 }
 0x3fd   : > { %v569_v39 = vadd.f32 %v568_v38, %v451_v17 }
 0x3ff   : > { %v572_v40 = vmax.f32 %v569_v39, 0.0 }
 0x401   : > { %v573_v41 = vpack.c.bf16 %v572_v40, %v572_v40 }
 0x403   : > { %785 = vmatmul.msk.bf16.vlgmr.msrb.gmra.mxu2 %vm485_vm2, %v573_v41 }
 0x404   : > { %v570_v42 = vpop.f32.mrf.mxu3 }
 0x486   : > { %v601_v44 = vpop.f32.mrf.mxu2 }
 0x487   : > { %v602_v45 = vadd.f32 %v878_v43, %v601_v44 }
 0x489   : > { %v605_v46 = vmax.f32 %v602_v45, 0.0 }
 0x48b   : > { %v606_v47 = vsel %vm485_vm2, %v605_v46, 0.0 }
 0x48c   : > { %v607_v48 = vrot.slane %v606_v47, 4 }
 0x48e   : > { %v608_v49 = vadd.f32 %v607_v48, %v606_v47  ;;  %v603_v50 = vpop.f32.mrf.mxu2 }
 0x490   : > { %v609_v51 = vrot.slane %v608_v49, 2 }
 0x492   : > { %v610_v52 = vadd.f32 %v609_v51, %v608_v49 }
 0x494   : > { %v611_v53 = vrot.slane %v610_v52, 1 }
 0x496   : > { %v612_v54 = vadd.f32 %v611_v53, %v610_v52 }
 0x498   : > { %v613_v55 = vmax.f32 %v612_v54, 0.0 }
 0x49a   : > { %615 = vst.msk [vmem:[%s407_s26] sm:$0x1] %vm614_vm3, %v613_v55 }
 0x49b   : > { %1056 = shalt.err (!%p1053_p12)
}
 0x49c   : > { %808 = dma.vmem_to_hbm [thread:$0]  (%p1242_p7), %s628_s10, 16, %s630_s2, %s617_s21  }
 0x49d PF: > { %s1394_s4 = sld [smem:[#allocation18_spill]]  ;;  %s641_s11 = sand.u32 1, %s1095_s27  }
 0x49e   : > { %s642_s19 = scalar_lea.sflag [#allocation4], %s641_s11 }
 0x4a3   : > { %p1395_p0 = scmp.ge.s32.totalorder %s1394_s4, 2 }
 0x4a5   : > { %p828_p9 = pnand %p1395_p0, %p1194_p6 }
 0x4a7   : > { %p829_p13 = pneg %p828_p9 }
 0x4a9   : > { %1090 = dma.done.wait (%p829_p13), %s642_s19, 16  }
 0x4aa   : > { %1092 = vsyncadd (%p829_p13), %s642_s19, 4294967280  ;;  %s1396_s30 = sld [smem:[#allocation19_spill]]  ;;  %s1399_s27 = smov %s1099_s28 }
 0x4ab   : > { %s1397_s18 = sld [smem:[#allocation17_spill]] }
 0x4ac   : > { %s1398_s29 = sld [smem:[#allocation20_spill]] }
 0x4b0   : > { %p25_p3 = scmp.ge.s32.totalorder %s1396_s30, 4  }
 0x4b1   : > { %s1400_s28 = smov %s1397_s18 }
 0x4b2   :  { %27 = sbr.rel (!%p25_p3) target bundleno = 12 (0xc), region = 122 }
 0x4b7   :  { %647 = vsyncpa [#allocation3], 1 }
 0x4b8   :  { %649 = vsyncpa [#allocation3 + $0x1], 1 }
 0x4b9   :  { %650 = vsyncpa [#allocation6], 1 }
 0x4ba   :  { %652 = vsyncpa [#allocation6 + $0x1], 1 }
 0x4bb   :  { %653 = vsyncpa [#allocation9], 1 }
 0x4bc   :  { %654 = vsyncpa [#allocation4], 1 }
 0x4bd   :  { %656 = vsyncpa [#allocation4 + $0x1], 1 }

</bundles_post_ra>
